<compile_context>
chip_gen: v5e
topology: v5e:2x2
jax: 0.10.0
libtpu: 0.0.40
codegen_flags: <defaults>
</compile_context>

<pallas_src>
import jax
import jax.numpy as jnp
from jax.experimental import pallas as pl
from jax.experimental.pallas import tpu as pltpu

# ----------------------------- sizes (small, synthetic) -----------------------------
N_OPTIONS = 4            # args.mpm_args.dim_c
K = N_OPTIONS + 1        # rows per sample fed through the MPM
B = 4                    # number of samples
OBS_DIM = 24             # flat public-observation feature size
N_RANGES = 16            # range-idx vocabulary
EMB_DIM = 8              # range embedding width
MPM_UNITS = 32           # self._mpm.output_units
N_UNITS_FINAL = 32       # args.n_units_final
LANES = 128              # TPU lane width; everything is zero-padded to this

# ----------------------------- packed weight-slab layout -----------------------------
# All row offsets are multiples of 8 so every static slice starts on a sublane tile.
R_EMB = 0                          # fused (range_emb @ w1_emb + b1) table, N_RANGES rows
R_W1 = R_EMB + N_RANGES            # 16  : w1_obs (OBS_DIM rows)
R_WHEAD = 40                       # [wa | wv], zero-padded to LANES rows
R_BHEAD = R_WHEAD + LANES          # 168 : [ba | bv]
R_WFIN = 176                       # dueling-folded [wadv_c ; wv2_bcast], zero-padded to LANES rows
R_BFIN = R_WFIN + LANES            # 304 : folded output bias
SLAB_ROWS = 312


# ----------------------------- Pallas kernel -----------------------------
def _high_adv_kernel(obs_ref, rng_ref, w_ref, out_ref):
    """One batch block of tb samples (already option-gathered rows)."""
    f32 = jnp.float32

    # ---- static slices of the packed weight slab (zero-padded to 128 lanes) ----
    t_emb = w_ref[R_EMB:R_EMB + N_RANGES, :]        # (16, 128)  range_emb @ w1_emb + b1
    w1o = w_ref[R_W1:R_W1 + OBS_DIM, :]             # (24, 128)  w1_obs
    whead = w_ref[R_WHEAD:R_WHEAD + LANES, :]       # (128, 128) [wa | wv]
    bhead = w_ref[R_BHEAD:R_BHEAD + 1, :]           # (1, 128)
    wfin = w_ref[R_WFIN:R_WFIN + LANES, :]          # (128, 128) dueling-folded projection
    bfin = w_ref[R_BFIN:R_BFIN + 1, :]              # (1, 128)

    obs = obs_ref[...]                              # (tb, OBS_DIM) f32
    rng = rng_ref[...]                              # (tb, 1) int32
    tb = rng.shape[0]

    # ---- MPM on the tb selected rows only ----
    # Embedding gather as one-hot MXU matmul (b1 folded into t_emb) + obs linear.
    r_iota = jax.lax.broadcasted_iota(jnp.int32, (tb, N_RANGES), 1)
    rng_oh = (r_iota == rng).astype(f32)            # (tb, 16) one-hot
    h = jnp.dot(obs, w1o, preferred_element_type=f32)
    h = h + jnp.dot(rng_oh, t_emb, preferred_element_type=f32)
    h = jnp.maximum(h, 0.0)                         # (tb, 128); cols >= MPM_UNITS are 0

    # ---- fused heads: [ya | yv] then dueling-folded final projection ----
    y = jnp.maximum(jnp.dot(h, whead, preferred_element_type=f32) + bhead, 0.0)
    # out = val + (adv - mean(adv)) already folded into wfin/bfin; padded lanes stay 0.
    out_ref[...] = jnp.dot(y, wfin, preferred_element_type=f32) + bfin


# ----------------------------- parameter packing (one VMEM slab) -----------------------------
def pack_params(params):
    u, f = MPM_UNITS, N_UNITS_FINAL
    w1_obs = params["w1"][:OBS_DIM, :]                            # (24, U)
    w1_emb = params["w1"][OBS_DIM:, :]                            # (EMB_DIM, U)
    # Fused embedding table with b1 folded in (one-hot rows sum to exactly 1).
    t_emb = params["range_emb"] @ w1_emb + params["b1"]           # (N_RANGES, U)

    whead = jnp.concatenate([params["wa"], params["wv"]], axis=1)   # (U, 2F)
    bhead = jnp.concatenate([params["ba"], params["bv"]], axis=1)   # (1, 2F)

    # Dueling combine folded into the final projection:
    #   out = (y_a @ wadv + badv) - mean_j(...) + (y_v @ wv2 + bv2)
    #       = y @ [[wadv - mean_cols(wadv)], [wv2 broadcast]] + (badv - mean(badv) + bv2)
    wadv_c = params["wadv"] - jnp.mean(params["wadv"], axis=1, keepdims=True)
    badv_c = params["badv"] - jnp.mean(params["badv"], axis=1, keepdims=True)
    wfin = jnp.concatenate(
        [wadv_c, jnp.broadcast_to(params["wv2"], (f, N_OPTIONS))], axis=0)  # (2F, N)
    bfin = badv_c + params["bv2"]                                           # (1, N)

    slab = jnp.zeros((SLAB_ROWS, LANES), jnp.float32)
    slab = slab.at[R_EMB:R_EMB + N_RANGES, :u].set(t_emb)
    slab = slab.at[R_W1:R_W1 + OBS_DIM, :u].set(w1_obs)
    slab = slab.at[R_WHEAD:R_WHEAD + u, :2 * f].set(whead)
    slab = slab.at[R_BHEAD, :2 * f].set(bhead[0])
    slab = slab.at[R_WFIN:R_WFIN + 2 * f, :N_OPTIONS].set(wfin)
    slab = slab.at[R_BFIN, :N_OPTIONS].set(bfin[0])
    return slab


def _choose_tb(batch: int) -> int:
    """Batch-tile size: a large multiple of 8 (amortizes ~0.35us/grid-step and
    fills the MXU M dim) with >= 2 blocks so ("parallel",) shards across v7x's
    two TensorCores.  Small / non-multiple-of-8 batches use one full-array
    block, which always satisfies the (8,128) tiling rule."""
    if batch % 8 != 0:
        return batch
    for tb in (512, 256, 128, 64, 32, 16, 8):
        if batch % tb == 0 and batch // tb >= 2:
            return tb
    return batch


# ----------------------------- wrapper -----------------------------
def high_adv_vet_forward(pub_obses, range_idxs, option_idxs, params):
    """pub_obses: (B*K, OBS_DIM) f32, range_idxs: (B*K,) i32, option_idxs: (B,) i32."""
    slab = pack_params(params)
    obs_all = pub_obses.astype(jnp.float32)
    rng_all = range_idxs.astype(jnp.int32)
    opt = option_idxs.astype(jnp.int32)
    batch = opt.shape[0]

    # Option gather BEFORE the MPM (row-wise MPM commutes with the row gather):
    # pick the one selected row per sample here, so the kernel touches only
    # `batch` rows (5x less DMA/MXU/VPU) and no O(tb^2) selection matmul exists.
    # Note: out-of-range option indices are clamped (torch.gather would raise).
    rows = jnp.arange(batch, dtype=jnp.int32) * K + jnp.clip(opt, 0, K - 1)
    obs = jnp.take(obs_all, rows, axis=0)                   # (batch, OBS_DIM)
    rng = jnp.take(rng_all, rows, axis=0).reshape(-1, 1)    # (batch, 1)

    tb = _choose_tb(batch)
    grid = (pl.cdiv(batch, tb),)

    out = pl.pallas_call(
        _high_adv_kernel,
        out_shape=jax.ShapeDtypeStruct((batch, LANES), jnp.float32),
        grid=grid,
        in_specs=[
            pl.BlockSpec((tb, OBS_DIM), lambda i: (i, 0)),       # selected obs rows
            pl.BlockSpec((tb, 1), lambda i: (i, 0)),             # selected range idxs
            pl.BlockSpec((SLAB_ROWS, LANES), lambda i: (0, 0)),  # packed weight slab (shared)
        ],
        out_specs=pl.BlockSpec((tb, LANES), lambda i: (i, 0)),
        compiler_params=pltpu.CompilerParams(
            dimension_semantics=("parallel",)),                  # shards blocks across TCs on v7x
    )(obs, rng, slab)

    return out[:, :N_OPTIONS]


# ----------------------------- pure-JAX reference (unfused formulation) -----------------------------
def reference_forward(pub_obses, range_idxs, option_idxs, params):
    emb = params["range_emb"][range_idxs]
    x = jnp.concatenate([pub_obses, emb], axis=-1).astype(jnp.float32)
    h = jnp.maximum(x @ params["w1"] + params["b1"], 0.0)
    h3 = h.reshape(-1, K, MPM_UNITS)
    idx = option_idxs.reshape(-1, 1, 1)
    shared = jnp.take_along_axis(
        h3, jnp.broadcast_to(idx, (h3.shape[0], 1, MPM_UNITS)), axis=1)[:, 0, :]
    ya = jnp.maximum(shared @ params["wa"] + params["ba"], 0.0)
    adv = ya @ params["wadv"] + params["badv"]
    adv = adv - jnp.mean(adv, axis=-1, keepdims=True)
    yv = jnp.maximum(shared @ params["wv"] + params["bv"], 0.0)
    val = yv @ params["wv2"] + params["bv2"]
    return val + adv


# ----------------------------- deterministic params -----------------------------
def make_params(key):
    ks = jax.random.split(key, 12)
    fin = OBS_DIM + EMB_DIM

    def lin(kw, kb, n_in, n_out):
        bound = 1.0 / jnp.sqrt(n_in)
        w = jax.random.uniform(kw, (n_in, n_out), jnp.float32, -bound, bound)
        b = jax.random.uniform(kb, (1, n_out), jnp.float32, -bound, bound)
        return w, b

    w1, b1 = lin(ks[0], ks[1], fin, MPM_UNITS)
    wa, ba = lin(ks[2], ks[3], MPM_UNITS, N_UNITS_FINAL)
    wadv, badv = lin(ks[4], ks[5], N_UNITS_FINAL, N_OPTIONS)
    wv, bv = lin(ks[6], ks[7], MPM_UNITS, N_UNITS_FINAL)
    wv2, bv2 = lin(ks[8], ks[9], N_UNITS_FINAL, 1)
    range_emb = jax.random.normal(ks[10], (N_RANGES, EMB_DIM), jnp.float32) * 0.1
    return dict(range_emb=range_emb, w1=w1, b1=b1, wa=wa, ba=ba,
                wadv=wadv, badv=badv, wv=wv, bv=bv, wv2=wv2, bv2=bv2)


if __name__ == "__main__":
    key = jax.random.PRNGKey(0)
    k_par, k_obs, k_rng, k_opt = jax.random.split(key, 4)

    params = make_params(k_par)
    pub_obses = jax.random.normal(k_obs, (B * K, OBS_DIM), jnp.float32)
    range_idxs = jax.random.randint(k_rng, (B * K,), 0, N_RANGES, jnp.int32)
    option_idxs = jax.random.randint(k_opt, (B,), 0, K, jnp.int32)

    out = high_adv_vet_forward(pub_obses, range_idxs, option_idxs, params)
    out = jax.block_until_ready(out)

    ref = reference_forward(pub_obses, range_idxs, option_idxs, params)
    assert out.shape == (B, N_OPTIONS)
    assert jnp.allclose(out, ref, atol=5e-5, rtol=5e-5), "mismatch vs JAX reference"

    print("KERNEL_OK")
</pallas_src>

<mosaic_0001>
module attributes {stable_mosaic.version = 11 : i64} {
  func.func @_high_adv_kernel(%arg0: i32, %arg1: memref<4x24xf32, #tpu.memory_space<vmem>>, %arg2: memref<4x1xi32, #tpu.memory_space<vmem>>, %arg3: memref<312x128xf32, #tpu.memory_space<vmem>>, %arg4: memref<4x128xf32, #tpu.memory_space<vmem>>) attributes {dimension_semantics = [#tpu.dimension_semantics<parallel>], iteration_bounds = array<i64: 1>, scalar_prefetch = 0 : i64, scratch_operands = 0 : i64, tpu.core_type = #tpu.core_type<tc>, window_params = [{transform_indices = @transform_0, window_bounds = array<i64: 4, 24>}, {transform_indices = @transform_1, window_bounds = array<i64: 4, 1>}, {pipeline_mode = #tpu.pipeline_mode<synchronous>, transform_indices = @transform_2, window_bounds = array<i64: 312, 128>}, {transform_indices = @transform_3, window_bounds = array<i64: 4, 128>}]} {
    %c0 = arith.constant 0 : index
    %c0_0 = arith.constant 0 : index
    %0 = vector.load %arg3[%c0, %c0_0] : memref<312x128xf32, #tpu.memory_space<vmem>>, vector<16x128xf32>
    %c16 = arith.constant 16 : index
    %c0_1 = arith.constant 0 : index
    %1 = vector.load %arg3[%c16, %c0_1] : memref<312x128xf32, #tpu.memory_space<vmem>>, vector<24x128xf32>
    %c40 = arith.constant 40 : index
    %c0_2 = arith.constant 0 : index
    %2 = vector.load %arg3[%c40, %c0_2] : memref<312x128xf32, #tpu.memory_space<vmem>>, vector<128x128xf32>
    %c168 = arith.constant 168 : index
    %c0_3 = arith.constant 0 : index
    %3 = vector.load %arg3[%c168, %c0_3] : memref<312x128xf32, #tpu.memory_space<vmem>>, vector<1x128xf32>
    %c176 = arith.constant 176 : index
    %c0_4 = arith.constant 0 : index
    %4 = vector.load %arg3[%c176, %c0_4] : memref<312x128xf32, #tpu.memory_space<vmem>>, vector<128x128xf32>
    %c304 = arith.constant 304 : index
    %c0_5 = arith.constant 0 : index
    %5 = vector.load %arg3[%c304, %c0_5] : memref<312x128xf32, #tpu.memory_space<vmem>>, vector<1x128xf32>
    %c0_6 = arith.constant 0 : index
    %c0_7 = arith.constant 0 : index
    %6 = vector.load %arg1[%c0_6, %c0_7] : memref<4x24xf32, #tpu.memory_space<vmem>>, vector<4x24xf32>
    %c0_8 = arith.constant 0 : index
    %c0_9 = arith.constant 0 : index
    %7 = vector.load %arg2[%c0_8, %c0_9] : memref<4x1xi32, #tpu.memory_space<vmem>>, vector<4x1xi32>
    %8 = tpu.iota {dimensions = array<i32: 1>} : vector<4x16xi32>
    %9 = vector.broadcast %7 : vector<4x1xi32> to vector<4x16xi32>
    %10 = arith.cmpi eq, %8, %9 : vector<4x16xi32>
    %11 = arith.extui %10 : vector<4x16xi1> to vector<4x16xi32>
    %12 = arith.sitofp %11 : vector<4x16xi32> to vector<4x16xf32>
    %cst = arith.constant dense<0.000000e+00> : vector<4x128xf32>
    %13 = tpu.matmul %6, %1, %cst {dimension_numbers = #tpu.dot_dimension_numbers<[1], [0], [0], [1], [0, 0, 1, 1], [], []>} : vector<4x24xf32>, vector<24x128xf32>, vector<4x128xf32> -> vector<4x128xf32>
    %cst_10 = arith.constant dense<0.000000e+00> : vector<4x128xf32>
    %14 = tpu.matmul %12, %0, %cst_10 {dimension_numbers = #tpu.dot_dimension_numbers<[1], [0], [0], [1], [0, 0, 1, 1], [], []>} : vector<4x16xf32>, vector<16x128xf32>, vector<4x128xf32> -> vector<4x128xf32>
    %15 = arith.addf %13, %14 : vector<4x128xf32>
    %cst_11 = arith.constant 0.000000e+00 : f32
    %16 = vector.broadcast %cst_11 : f32 to vector<4x128xf32>
    %17 = arith.maximumf %15, %16 : vector<4x128xf32>
    %cst_12 = arith.constant dense<0.000000e+00> : vector<4x128xf32>
    %18 = tpu.matmul %17, %2, %cst_12 {dimension_numbers = #tpu.dot_dimension_numbers<[1], [0], [0], [1], [0, 0, 1, 1], [], []>} : vector<4x128xf32>, vector<128x128xf32>, vector<4x128xf32> -> vector<4x128xf32>
    %19 = vector.broadcast %3 : vector<1x128xf32> to vector<4x128xf32>
    %20 = arith.addf %18, %19 : vector<4x128xf32>
    %cst_13 = arith.constant 0.000000e+00 : f32
    %21 = vector.broadcast %cst_13 : f32 to vector<4x128xf32>
    %22 = arith.maximumf %20, %21 : vector<4x128xf32>
    %cst_14 = arith.constant dense<0.000000e+00> : vector<4x128xf32>
    %23 = tpu.matmul %22, %4, %cst_14 {dimension_numbers = #tpu.dot_dimension_numbers<[1], [0], [0], [1], [0, 0, 1, 1], [], []>} : vector<4x128xf32>, vector<128x128xf32>, vector<4x128xf32> -> vector<4x128xf32>
    %24 = vector.broadcast %5 : vector<1x128xf32> to vector<4x128xf32>
    %25 = arith.addf %23, %24 : vector<4x128xf32>
    %c0_15 = arith.constant 0 : index
    %c0_16 = arith.constant 0 : index
    %26 = vector.load %arg4[%c0_15, %c0_16] : memref<4x128xf32, #tpu.memory_space<vmem>>, vector<4x128xf32>
    tpu.vector_store %arg4[%c0_15, %c0_16], %25 {strides = array<i32>} : memref<4x128xf32, #tpu.memory_space<vmem>>, vector<4x128xf32>,
    return
  }
  func.func @transform_0(%arg0: i32) -> (i32, i32) {
    %c0_i32 = arith.constant 0 : i32
    %c0_i32_0 = arith.constant 0 : i32
    return %arg0, %c0_i32 : i32, i32
  }
  func.func @transform_1(%arg0: i32) -> (i32, i32) {
    %c0_i32 = arith.constant 0 : i32
    %c0_i32_0 = arith.constant 0 : i32
    return %arg0, %c0_i32 : i32, i32
  }
  func.func @transform_2(%arg0: i32) -> (i32, i32) {
    %c0_i32 = arith.constant 0 : i32
    %c0_i32_0 = arith.constant 0 : i32
    %c0_i32_1 = arith.constant 0 : i32
    return %c0_i32, %c0_i32_0 : i32, i32
  }
  func.func @transform_3(%arg0: i32) -> (i32, i32) {
    %c0_i32 = arith.constant 0 : i32
    %c0_i32_0 = arith.constant 0 : i32
    return %arg0, %c0_i32 : i32, i32
  }
}

</mosaic_0001>

<bundles_post_ra>
// kernel: tpu_custom_call.1
= control target key start
LH: loop header
LB: loop body
LE: loop exit
PB: predicated region body
PF: predicated region fallthrough
CT: control target
= control target key end

     0   :  { %8 = vsyncpa [#allocation3], 0  ;;  %s292_s0 = inlined_call_operand.vmem [shape: f32[4,24], index: 0, kind: input, shape index: {}]   ;;  %s293_s1 = inlined_call_operand.vmem [shape: s32[4,1], index: 1, kind: input, shape index: {}]   ;;  %s294_s2 = inlined_call_operand.hbm [shape: f32[312,128], index: 2, kind: input, shape index: {}]   ;;  %s295_s3 = inlined_call_operand.hbm [shape: f32[4,128], index: 3, kind: output, shape index: {}]  }
   0x1   :  { %9 = vsyncpa [#allocation4], 0  ;;  %s18_s14 = sshll.u32 %s294_s2, 4  ;;  %s254_s15 = smov [#allocation2]   ;;  %s19_s14 = int_to_ptr.hbm [resolvable:$true] %s18_s14 }
   0x2   :  { %s20_s16 = sshll.u32 %s254_s15, 4  ;;  %s255_s17 = smov 128   ;;  %s21_s16 = int_to_ptr.vmem [resolvable:$true] %s20_s16 }
   0x3   :  { %s256_s18 = smov 8  }
   0x4   :  { %26 = dma.hbm_to_vmem [thread:$0]  %s19_s14, 4992, %s21_s16, [#allocation3], %s255_s17, %s255_s17, %s256_s18  }
   0x5   :  { %250 = dma.done.wait [#allocation3], 4992  }
   0x6   :  { %251 = vsyncadd [#allocation3], 4294962304  ;;  %v257_v0 = vmov 0   ;;  %v71_v1 = vld [vmem:[%s293_s1] sm:$0xf]  ;;  %v32_v3 = vld [vmem:[#allocation2 + $0x8] sm:$0xff]  ;;  %v72_v20 = vlaneseq }
   0x7   :  { %199 = vset.pattern.permute.xlu0 %v257_v0  ;;  %v35_v2 = vld [vmem:[#allocation2 + $0x20] sm:$0xff]  ;;  %v34_v4 = vld [vmem:[#allocation2 + $0x18] sm:$0xff]  ;;  %98 = vmatpush.msra.mxu0 %v32_v3  ;;  %v33_v6 = vld [vmem:[#allocation2 + $0x10] sm:$0xff]  ;;  %vm104_vm0 = vcmask 195584   ;;  %vm80_vm1 = vcmask 130048   ;;  %v258_v24 = vmov 0.0  }
   0x8   :  { %75 = vperm.xlu0 %199, %v71_v1   ;;  %121 = vmatpush.msra.mxu1 %v35_v2  ;;  %v31_v5 = vld [vmem:[#allocation2] sm:$0xff]  ;;  %v50_v9 = vld [vmem:[#allocation2 + $0x98] sm:$0xff]  ;;  %v49_v10 = vld [vmem:[#allocation2 + $0x90] sm:$0xff]  ;;  %v73_v22 = vand.u32 127, %v72_v20  ;;  %s180_s24 = sshll.u32 %s295_s3, 4  ;;  %s181_s24 = int_to_ptr.hbm [resolvable:$true] %s180_s24 }
   0x9   :  { %99 = vmatpush.msra.mxu0 %v31_v5  ;;  %v70_v7 = vld [vmem:[%s292_s0] sm:$0xf]  ;;  %v48_v11 = vld [vmem:[#allocation2 + $0x88] sm:$0xff]  ;;  %v46_v13 = vld [vmem:[#allocation2 + $0x78] sm:$0xff]  ;;  %s259_s0 = smov [#allocation5]  }
   0xa   :  { %122 = vmatpush.msra.mxu1 %v34_v4  ;;  %v51_v8 = vld [vmem:[#allocation2 + $0xa0] sm:$0xff]  ;;  %v45_v14 = vld [vmem:[#allocation2 + $0x70] sm:$0xff]  ;;  %v44_v15 = vld [vmem:[#allocation2 + $0x68] sm:$0xff]  ;;  %s178_s1 = sshll.u32 %s259_s0, 4  ;;  %s179_s1 = int_to_ptr.vmem [resolvable:$true] %s178_s1 }
   0xb   :  { %130 = vmatpush.msra.mxu2 %v51_v8  ;;  %v47_v12 = vld [vmem:[#allocation2 + $0x80] sm:$0xff]  ;;  %v42_v17 = vld [vmem:[#allocation2 + $0x58] sm:$0xff]  ;;  %v41_v18 = vld [vmem:[#allocation2 + $0x50] sm:$0xff] }
   0xc   :  { %123 = vmatpush.msra.mxu1 %v33_v6  ;;  %v43_v16 = vld [vmem:[#allocation2 + $0x60] sm:$0xff]  ;;  %v40_v19 = vld [vmem:[#allocation2 + $0x48] sm:$0xff]  ;;  %v38_v26 = vld [vmem:[#allocation2 + $0x38] sm:$0xff] }
   0xd   :  { %192 = vmatmul.msk.f32.vlgmr.msra.gmra.mxu1 %vm104_vm0, %v70_v7  ;;  %131 = vmatpush.msra.mxu2 %v50_v9  ;;  %v39_v21 = vld [vmem:[#allocation2 + $0x40] sm:$0xff]  ;;  %v37_v27 = vld [vmem:[#allocation2 + $0x30] sm:$0xff]  ;;  %v36_v28 = vld [vmem:[#allocation2 + $0x28] sm:$0xff] }
   0xe   :  { %v68_v29 = vld [vmem:[#allocation2 + $0x128] sm:$0xff]  ;;  %v67_v30 = vld [vmem:[#allocation2 + $0x120] sm:$0xff]  ;;  %v66_v31 = vld [vmem:[#allocation2 + $0x118] sm:$0xff] }
   0xf   :  { %132 = vmatpush.msra.mxu2 %v49_v10  ;;  %152 = vmatpush.msra.mxu3 %v68_v29  ;;  %v65_v32 = vld [vmem:[#allocation2 + $0x110] sm:$0xff]  ;;  %v64_v33 = vld [vmem:[#allocation2 + $0x108] sm:$0xff]  ;;  %v63_v34 = vld [vmem:[#allocation2 + $0x100] sm:$0xff] }
  0x10   :  { %v62_v35 = vld [vmem:[#allocation2 + $0xf8] sm:$0xff]  ;;  %v61_v36 = vld [vmem:[#allocation2 + $0xf0] sm:$0xff]  ;;  %v60_v37 = vld [vmem:[#allocation2 + $0xe8] sm:$0xff] }
  0x11   :  { %133 = vmatpush.msra.mxu2 %v48_v11  ;;  %153 = vmatpush.msra.mxu3 %v67_v30  ;;  %v59_v38 = vld [vmem:[#allocation2 + $0xe0] sm:$0xff]  ;;  %v58_v39 = vld [vmem:[#allocation2 + $0xd8] sm:$0xff]  ;;  %v57_v40 = vld [vmem:[#allocation2 + $0xd0] sm:$0xff] }
  0x12   :  { %v56_v41 = vld [vmem:[#allocation2 + $0xc8] sm:$0xff]  ;;  %v55_v46 = vld [vmem:[#allocation2 + $0xc0] sm:$0xff]  ;;  %v54_v47 = vld [vmem:[#allocation2 + $0xb8] sm:$0xff] }
  0x13   :  { %134 = vmatpush.msra.mxu2 %v47_v12  ;;  %154 = vmatpush.msra.mxu3 %v66_v31  ;;  %v53_v48 = vld [vmem:[#allocation2 + $0xb0] sm:$0xff]  ;;  %v200_v49 = vld [vmem:[#allocation2 + $0xa8] ss:$0 sm:$0xff] }
  0x14   :  { %v201_v53 = vld [vmem:[#allocation2 + $0x130] ss:$0 sm:$0xff] }
  0x15   :  { %135 = vmatpush.msra.mxu2 %v46_v13  ;;  %155 = vmatpush.msra.mxu3 %v65_v32 }
  0x17   :  { %136 = vmatpush.msra.mxu2 %v45_v14  ;;  %156 = vmatpush.msra.mxu3 %v64_v33 }
  0x19   :  { %137 = vmatpush.msra.mxu2 %v44_v15  ;;  %157 = vmatpush.msra.mxu3 %v63_v34 }
  0x1b   :  { %138 = vmatpush.msra.mxu2 %v43_v16  ;;  %158 = vmatpush.msra.mxu3 %v62_v35 }
  0x1d   :  { %139 = vmatpush.msra.mxu2 %v42_v17  ;;  %159 = vmatpush.msra.mxu3 %v61_v36 }
  0x1f   :  { %140 = vmatpush.msra.mxu2 %v41_v18  ;;  %160 = vmatpush.msra.mxu3 %v60_v37 }
  0x21   :  { %141 = vmatpush.msra.mxu2 %v40_v19  ;;  %161 = vmatpush.msra.mxu3 %v59_v38 }
  0x23   :  { %142 = vmatpush.msra.mxu2 %v39_v21  ;;  %162 = vmatpush.msra.mxu3 %v58_v39 }
  0x25   :  { %143 = vmatpush.msra.mxu2 %v38_v26  ;;  %163 = vmatpush.msra.mxu3 %v57_v40 }
  0x27   :  { %144 = vmatpush.msra.mxu2 %v37_v27  ;;  %164 = vmatpush.msra.mxu3 %v56_v41 }
  0x29   :  { %145 = vmatpush.msra.mxu2 %v36_v28  ;;  %165 = vmatpush.msra.mxu3 %v55_v46 }
  0x2b   :  { %166 = vmatpush.msra.mxu3 %v54_v47 }
  0x2d   :  { %167 = vmatpush.msra.mxu3 %v53_v48 }
  0x7a   :  { %v76_v23 = vpop.permute.xlu0 %75 }
  0x7b   :  { %vm77_vm2 = vcmp.eq.s32.totalorder %v73_v22, %v76_v23 }
  0x7c   :  { %v190_v25 = vsel %vm77_vm2, 1.0, %v258_v24 }
  0x7d   :  { %191 = vmatmul.msk.f32.vlgmr.msra.gmra.mxu0 %vm80_vm1, %v190_v25 }
  0x8a   :  { %v125_v42 = vpop.f32.mrf.mxu1 }
  0xfa   :  { %v101_v43 = vpop.f32.mrf.mxu0 }
  0xfb   :  { %v126_v44 = vadd.f32 %v125_v42, %v101_v43 }
  0xfd   :  { %v128_v45 = vmax.f32 %v126_v44, 0.0 }
  0xff   :  { %146 = vmatmul.f32.vlgmr.msra.gmra.mxu2 %v128_v45 }
 0x182   :  { %v147_v50 = vpop.f32.mrf.mxu2 }
 0x183   :  { %v148_v51 = vadd.f32 %v200_v49, %v147_v50 }
 0x185   :  { %v150_v52 = vmax.f32 %v148_v51, 0.0 }
 0x187   :  { %168 = vmatmul.f32.vlgmr.msra.gmra.mxu3 %v150_v52 }
 0x20a   :  { %v169_v54 = vpop.f32.mrf.mxu3 }
 0x20b   :  { %v170_v55 = vadd.f32 %v201_v53, %v169_v54 }
 0x20d   :  { %172 = vst [vmem:[#allocation5] sm:$0xf] %v170_v55 }
 0x20e   :  { %183 = dma.vmem_to_hbm [thread:$0]  %s179_s1, 64, %s181_s24, [#allocation4]  }
 0x20f   :  { %252 = dma.done.wait [#allocation4], 64  }
 0x210   :  { %253 = vsyncadd [#allocation4], 4294967232 }
 0x211   :  { %188 = vsyncpa [#allocation3], 1 }
 0x212   :  { %189 = vsyncpa [#allocation4], 1 }

</bundles_post_ra>
